<compile_context>
chip_gen: v7x
topology: tpu7x:2x2x1
jax: 0.10.0
libtpu: 0.0.40
codegen_flags: <defaults>
</compile_context>

<pallas_src>
import functools

import jax
import jax.numpy as jnp
from jax.experimental import pallas as pl
from jax.experimental.pallas import tpu as pltpu


def _ffn_kernel(x_ref, w1t_ref, b1_ref, w2t_ref, b2_ref, gamma_ref, beta_ref,
                o_ref, acc_ref, *, eps, apply_ln, compute_dtype):
    """Grid = (row_blocks ["parallel"], inner_blocks ["arbitrary", reduction])."""
    j = pl.program_id(1)
    nj = pl.num_programs(1)

    x = x_ref[...]                                    # (tile_rows, hid), compute_dtype

    # h_j = relu(x @ W1^T[:, j-block] + b1_j): native (M,K)@(K,N) on the MXU.
    h = jnp.dot(x, w1t_ref[...], preferred_element_type=jnp.float32)
    h = jnp.maximum(h + b1_ref[...], 0.0)             # (tile_rows, inner_block) f32

    @pl.when(j == 0)
    def _():
        acc_ref[...] = jnp.zeros_like(acc_ref)

    # y += h_j @ W2^T[j-block, :]  (f32 accumulator resident in VMEM scratch)
    acc_ref[...] += jnp.dot(h.astype(compute_dtype), w2t_ref[...],
                            preferred_element_type=jnp.float32)

    @pl.when(j == nj - 1)
    def _():
        # bias, residual (dropout == identity at inference), torch-style LN (f32).
        z = acc_ref[...] + b2_ref[...] + x.astype(jnp.float32)
        if apply_ln:
            d = z.shape[-1]
            mu = jnp.mean(z, axis=-1, keepdims=True)
            diff = z - mu
            # torch.std -> unbiased (n-1) std; eps added to sigma, not variance.
            var = jnp.sum(diff * diff, axis=-1, keepdims=True) * (1.0 / (d - 1))
            sigma = jnp.sqrt(var)
            z = diff / (sigma + eps)                  # exact divide (strict parity)
            z = z * gamma_ref[...] + beta_ref[...]
        o_ref[...] = z.astype(o_ref.dtype)


def _round_up(n, m):
    return ((n + m - 1) // m) * m


def _chip_profile():
    """(is_v7x, vmem_limit_cap_bytes); conservative default on unknown chips."""
    try:
        kind = jax.devices()[0].device_kind.lower()
    except Exception:
        return False, 32 * 1024 * 1024
    if "v7" in kind:
        return True, 48 * 1024 * 1024             # 64 MiB physical -> keep headroom
    if any(t in kind for t in ("v4", "v5", "v6")):
        return False, 96 * 1024 * 1024            # 128 MiB physical
    return False, 32 * 1024 * 1024


def _vmem_limit_bytes(tile_rows, hid, inner_block, cbytes, out_bytes, cap):
    f32 = 4
    x_io = 2 * tile_rows * hid * cbytes                  # double-buffered input tile
    o_io = 2 * tile_rows * hid * out_bytes               # double-buffered output tile
    wts = 2 * 2 * hid * inner_block * cbytes             # W1^T + W2^T (dbl-buffered)
    small = 2 * (inner_block + 3 * hid) * f32            # b1, b2, gamma, beta
    acc = tile_rows * hid * f32                          # scratch accumulator
    live = tile_rows * inner_block * (f32 + cbytes) + 4 * tile_rows * hid * f32
    need = x_io + o_io + wts + small + acc + live
    return int(min(max(2 * need, 8 * 1024 * 1024), cap))


def positionwise_feed_forward(x, w1, b1, w2, b2, gamma, beta, eps=1e-3,
                              compute_dtype=jnp.bfloat16):
    """x: (B, L, hid), w1: (inner, hid), w2: (hid, inner) -> (B, L, hid).

    compute_dtype = dtype of the MXU operands / activation HBM I/O (bf16 by
    default per perf review); accumulation, residual and LayerNorm stay f32.
    """
    B, L, hid = x.shape
    inner = w1.shape[0]
    apply_ln = (L != 1)            # the module skips layernorm when seq_len == 1
    if apply_ln and hid < 2:
        raise ValueError("unbiased std needs hid >= 2")

    N = B * L
    out_dtype = x.dtype
    cbytes = jnp.dtype(compute_dtype).itemsize
    out_bytes = jnp.dtype(out_dtype).itemsize

    # One-time HBM-side transposes: feed the MXU its native (M,K)@(K,N) layout.
    w1t = w1.T.astype(compute_dtype)                     # (hid, inner)
    w2t = w2.T.astype(compute_dtype)                     # (inner, hid)
    x2d = x.reshape(N, hid).astype(compute_dtype)        # (N, hid)

    b1_2d = b1.reshape(1, inner).astype(jnp.float32)
    b2_2d = b2.reshape(1, hid).astype(jnp.float32)
    gamma_2d = gamma.reshape(1, hid).astype(jnp.float32)
    beta_2d = beta.reshape(1, hid).astype(jnp.float32)

    is_v7, vmem_cap = _chip_profile()
    tile_cap = 256 if is_v7 else 512      # v5e/v6e: 128 MiB VMEM -> bigger row tiles
    row_align = max(8, 32 // cbytes)      # 8 for f32, 16 for bf16 sublane packing

    # Row tiling over the flattened (B*L) axis. No padding: Pallas masks the
    # ragged tail block (rows are independent; LN reduction is per-row).
    if N <= 2 * row_align:
        tile_rows = N                     # single full-dim block
    elif N <= 2 * tile_cap:
        # keep >= 2 row-steps so both v7x TensorCores get work ("parallel" axis)
        tile_rows = _round_up(-(-N // 2), row_align)
    else:
        tile_rows = tile_cap
    n_row_blocks = int(pl.cdiv(N, tile_rows))

    # Block `inner` (reduction axis, iterated last) when the resident,
    # double-buffered weights would crowd VMEM (matters on v7x's 64 MiB).
    inner_block = inner
    weight_budget = 24 * 1024 * 1024
    if 2 * 2 * hid * inner * cbytes > weight_budget:
        for k in (2, 4, 8, 16, 32, 64):
            cand = inner // k
            if inner % k == 0 and cand % 128 == 0:
                inner_block = cand
                if 2 * 2 * hid * cand * cbytes <= weight_budget:
                    break
    n_inner_blocks = inner // inner_block

    kernel = functools.partial(_ffn_kernel, eps=float(eps), apply_ln=apply_ln,
                               compute_dtype=compute_dtype)

    cost = pl.CostEstimate(
        flops=4 * N * hid * inner,
        transcendentals=(2 * N) if apply_ln else 0,      # sqrt + divide per row
        bytes_accessed=(N * hid * (cbytes + out_bytes)
                        + 2 * hid * inner * cbytes
                        + (inner + 3 * hid) * 4),
    )

    out2d = pl.pallas_call(
        kernel,
        out_shape=jax.ShapeDtypeStruct((N, hid), out_dtype),
        grid_spec=pltpu.PrefetchScalarGridSpec(
            num_scalar_prefetch=0,
            grid=(n_row_blocks, n_inner_blocks),
            in_specs=[
                # x rows: block index constant across inner axis -> stays resident.
                pl.BlockSpec((tile_rows, hid), lambda i, j: (i, 0)),
                # TODO(synk): mark the grid-invariant weight/bias specs below as
                # pipeline_mode=pl.Buffered(1) (single-buffered) once confirmed on
                # the deployment jax version; reclaims their second VMEM buffer.
                pl.BlockSpec((hid, inner_block), lambda i, j: (0, j)),    # W1^T
                pl.BlockSpec((1, inner_block), lambda i, j: (0, j)),      # b1
                pl.BlockSpec((inner_block, hid), lambda i, j: (j, 0)),    # W2^T
                pl.BlockSpec((1, hid), lambda i, j: (0, 0)),              # b2
                pl.BlockSpec((1, hid), lambda i, j: (0, 0)),              # gamma
                pl.BlockSpec((1, hid), lambda i, j: (0, 0)),              # beta
            ],
            out_specs=pl.BlockSpec((tile_rows, hid), lambda i, j: (i, 0)),
            scratch_shapes=[pltpu.VMEM((tile_rows, hid), jnp.float32)],
        ),
        compiler_params=pltpu.CompilerParams(
            dimension_semantics=("parallel", "arbitrary"),
            vmem_limit_bytes=_vmem_limit_bytes(
                tile_rows, hid, inner_block, cbytes, out_bytes, vmem_cap),
        ),
        cost_estimate=cost,
    )(x2d, w1t, b1_2d, w2t, b2_2d, gamma_2d, beta_2d)

    # TODO(synk): for hid < 128 deployments, pack k = 128 // hid rows per vreg row
    # (lane-dense out_spec) and adjust the LN reduction accordingly; hid that is
    # already a multiple of 128 needs nothing.
    return out2d.reshape(B, L, hid)


def _reference(x, w1, b1, w2, b2, gamma, beta, eps=1e-3):
    h = jnp.maximum(jnp.einsum("bld,fd->blf", x, w1) + b1, 0.0)
    y = jnp.einsum("blf,df->bld", h, w2) + b2
    z = y + x
    if x.shape[1] == 1:
        return z
    mu = jnp.mean(z, axis=-1, keepdims=True)
    sigma = jnp.std(z, axis=-1, keepdims=True, ddof=1)   # torch.std (unbiased)
    ln = (z - mu) / (sigma + eps)
    return ln * gamma + beta


if __name__ == "__main__":
    key = jax.random.PRNGKey(0)
    B, L, hid, inner = 2, 8, 32, 64
    kx, k1, kb1, k2, kb2 = jax.random.split(key, 5)

    x = jax.random.normal(kx, (B, L, hid), dtype=jnp.float32)
    w1 = jax.random.normal(k1, (inner, hid), dtype=jnp.float32) * 0.1
    b1 = jax.random.normal(kb1, (inner,), dtype=jnp.float32) * 0.1
    w2 = jax.random.normal(k2, (hid, inner), dtype=jnp.float32) * 0.1
    b2 = jax.random.normal(kb2, (hid,), dtype=jnp.float32) * 0.1
    gamma = jnp.ones((hid,), dtype=jnp.float32)    # a_2 init
    beta = jnp.zeros((hid,), dtype=jnp.float32)    # b_2 init

    ref = _reference(x, w1, b1, w2, b2, gamma, beta)

    # Default (bf16 MXU operands, f32 accumulation + LN) -> bf16-level tolerance.
    out = jax.block_until_ready(
        positionwise_feed_forward(x, w1, b1, w2, b2, gamma, beta))
    assert out.shape == (B, L, hid)
    assert jnp.allclose(out, ref, atol=4e-2, rtol=4e-2), "bf16 path mismatch"

    # Full f32 path: strict parity with the PyTorch module.
    out32 = jax.block_until_ready(positionwise_feed_forward(
        x, w1, b1, w2, b2, gamma, beta, compute_dtype=jnp.float32))
    assert jnp.allclose(out32, ref, atol=2e-3, rtol=2e-3), "f32 path mismatch"

    # Ragged row count (B*L not a multiple of the row tile): no pad/slice needed.
    xr = jax.random.normal(kx, (3, 7, hid), dtype=jnp.float32)
    outr = jax.block_until_ready(positionwise_feed_forward(
        xr, w1, b1, w2, b2, gamma, beta, compute_dtype=jnp.float32))
    refr = _reference(xr, w1, b1, w2, b2, gamma, beta)
    assert jnp.allclose(outr, refr, atol=2e-3, rtol=2e-3), "ragged path mismatch"

    # seq_len == 1 path (layernorm skipped, exactly as in the PyTorch module).
    x1 = jax.random.normal(kx, (B, 1, hid), dtype=jnp.float32)
    out1 = jax.block_until_ready(positionwise_feed_forward(
        x1, w1, b1, w2, b2, gamma, beta, compute_dtype=jnp.float32))
    ref1 = _reference(x1, w1, b1, w2, b2, gamma, beta)
    assert jnp.allclose(out1, ref1, atol=2e-3, rtol=2e-3), "L==1 path mismatch"

    print("KERNEL_OK")
</pallas_src>

<mosaic_0001>
module attributes {stable_mosaic.version = 11 : i64} {
  func.func @_ffn_kernel(%arg0: i32, %arg1: i32, %arg2: memref<16x32xbf16, #tpu.memory_space<vmem>>, %arg3: memref<32x64xbf16, #tpu.memory_space<vmem>>, %arg4: memref<1x64xf32, #tpu.memory_space<vmem>>, %arg5: memref<64x32xbf16, #tpu.memory_space<vmem>>, %arg6: memref<1x32xf32, #tpu.memory_space<vmem>>, %arg7: memref<1x32xf32, #tpu.memory_space<vmem>>, %arg8: memref<1x32xf32, #tpu.memory_space<vmem>>, %arg9: memref<16x32xf32, #tpu.memory_space<vmem>>, %arg10: memref<16x32xf32, #tpu.memory_space<vmem>>) attributes {dimension_semantics = [#tpu.dimension_semantics<parallel>, #tpu.dimension_semantics<arbitrary>], iteration_bounds = array<i64: 1, 1>, scalar_prefetch = 0 : i64, scratch_operands = 1 : i64, tpu.core_type = #tpu.core_type<tc>, window_params = [{transform_indices = @transform_0, window_bounds = array<i64: 16, 32>}, {transform_indices = @transform_1, window_bounds = array<i64: 32, 64>}, {transform_indices = @transform_2, window_bounds = array<i64: 1, 64>}, {transform_indices = @transform_3, window_bounds = array<i64: 64, 32>}, {pipeline_mode = #tpu.pipeline_mode<synchronous>, transform_indices = @transform_4, window_bounds = array<i64: 1, 32>}, {pipeline_mode = #tpu.pipeline_mode<synchronous>, transform_indices = @transform_5, window_bounds = array<i64: 1, 32>}, {pipeline_mode = #tpu.pipeline_mode<synchronous>, transform_indices = @transform_6, window_bounds = array<i64: 1, 32>}, {transform_indices = @transform_7, window_bounds = array<i64: 16, 32>}]} {
    %c0 = arith.constant 0 : index
    %c0_0 = arith.constant 0 : index
    %0 = vector.load %arg2[%c0, %c0_0] : memref<16x32xbf16, #tpu.memory_space<vmem>>, vector<16x32xbf16>
    %c0_1 = arith.constant 0 : index
    %c0_2 = arith.constant 0 : index
    %1 = vector.load %arg3[%c0_1, %c0_2] : memref<32x64xbf16, #tpu.memory_space<vmem>>, vector<32x64xbf16>
    %cst = arith.constant dense<0.000000e+00> : vector<16x64xf32>
    %2 = tpu.matmul %0, %1, %cst {dimension_numbers = #tpu.dot_dimension_numbers<[1], [0], [0], [1], [0, 0, 1, 1], [], []>} : vector<16x32xbf16>, vector<32x64xbf16>, vector<16x64xf32> -> vector<16x64xf32>
    %c0_3 = arith.constant 0 : index
    %c0_4 = arith.constant 0 : index
    %3 = vector.load %arg4[%c0_3, %c0_4] : memref<1x64xf32, #tpu.memory_space<vmem>>, vector<1x64xf32>
    %4 = vector.broadcast %3 : vector<1x64xf32> to vector<16x64xf32>
    %5 = arith.addf %2, %4 : vector<16x64xf32>
    %cst_5 = arith.constant 0.000000e+00 : f32
    %6 = vector.broadcast %cst_5 : f32 to vector<16x64xf32>
    %7 = arith.maximumf %5, %6 : vector<16x64xf32>
    %c0_i32 = arith.constant 0 : i32
    %8 = arith.cmpi eq, %arg1, %c0_i32 : i32
    %9 = arith.extui %8 : i1 to i32
    %c0_i32_6 = arith.constant 0 : i32
    %10 = arith.cmpi ne, %9, %c0_i32_6 : i32
    scf.if %10 {
      %cst_16 = arith.constant 0.000000e+00 : f32
      %20 = vector.broadcast %cst_16 : f32 to vector<16x32xf32>
      %c0_17 = arith.constant 0 : index
      %c0_18 = arith.constant 0 : index
      %21 = vector.load %arg10[%c0_17, %c0_18] : memref<16x32xf32, #tpu.memory_space<vmem>>, vector<16x32xf32>
      tpu.vector_store %arg10[%c0_17, %c0_18], %20 {strides = array<i32>} : memref<16x32xf32, #tpu.memory_space<vmem>>, vector<16x32xf32>,
    } else {
    }
    %c0_7 = arith.constant 0 : index
    %c0_8 = arith.constant 0 : index
    %11 = vector.load %arg10[%c0_7, %c0_8] : memref<16x32xf32, #tpu.memory_space<vmem>>, vector<16x32xf32>
    %12 = arith.truncf %7 : vector<16x64xf32> to vector<16x64xbf16>
    %c0_9 = arith.constant 0 : index
    %c0_10 = arith.constant 0 : index
    %13 = vector.load %arg5[%c0_9, %c0_10] : memref<64x32xbf16, #tpu.memory_space<vmem>>, vector<64x32xbf16>
    %cst_11 = arith.constant dense<0.000000e+00> : vector<16x32xf32>
    %14 = tpu.matmul %12, %13, %cst_11 {dimension_numbers = #tpu.dot_dimension_numbers<[1], [0], [0], [1], [0, 0, 1, 1], [], []>} : vector<16x64xbf16>, vector<64x32xbf16>, vector<16x32xf32> -> vector<16x32xf32>
    %15 = arith.addf %11, %14 : vector<16x32xf32>
    %c0_12 = arith.constant 0 : index
    %c0_13 = arith.constant 0 : index
    %16 = vector.load %arg10[%c0_12, %c0_13] : memref<16x32xf32, #tpu.memory_space<vmem>>, vector<16x32xf32>
    tpu.vector_store %arg10[%c0_12, %c0_13], %15 {strides = array<i32>} : memref<16x32xf32, #tpu.memory_space<vmem>>, vector<16x32xf32>,
    %c0_i32_14 = arith.constant 0 : i32
    %17 = arith.cmpi eq, %arg1, %c0_i32_14 : i32
    %18 = arith.extui %17 : i1 to i32
    %c0_i32_15 = arith.constant 0 : i32
    %19 = arith.cmpi ne, %18, %c0_i32_15 : i32
    scf.if %19 {
      %c0_16 = arith.constant 0 : index
      %c0_17 = arith.constant 0 : index
      %20 = vector.load %arg10[%c0_16, %c0_17] : memref<16x32xf32, #tpu.memory_space<vmem>>, vector<16x32xf32>
      %c0_18 = arith.constant 0 : index
      %c0_19 = arith.constant 0 : index
      %21 = vector.load %arg6[%c0_18, %c0_19] : memref<1x32xf32, #tpu.memory_space<vmem>>, vector<1x32xf32>
      %22 = vector.broadcast %21 : vector<1x32xf32> to vector<16x32xf32>
      %23 = arith.addf %20, %22 : vector<16x32xf32>
      %24 = arith.extf %0 : vector<16x32xbf16> to vector<16x32xf32>
      %25 = arith.addf %23, %24 : vector<16x32xf32>
      %cst_20 = arith.constant dense<0.000000e+00> : vector<16xf32>
      %26 = vector.multi_reduction <add>, %25, %cst_20 [1] : vector<16x32xf32> to vector<16xf32>
      %27 = vector.shape_cast %26 : vector<16xf32> to vector<16x1xf32>
      %cst_21 = arith.constant 3.200000e+01 : f32
      %28 = vector.broadcast %cst_21 : f32 to vector<16x1xf32>
      %29 = arith.divf %27, %28 : vector<16x1xf32>
      %30 = vector.broadcast %29 : vector<16x1xf32> to vector<16x32xf32>
      %31 = arith.subf %25, %30 : vector<16x32xf32>
      %32 = arith.mulf %31, %31 : vector<16x32xf32>
      %cst_22 = arith.constant dense<0.000000e+00> : vector<16xf32>
      %33 = vector.multi_reduction <add>, %32, %cst_22 [1] : vector<16x32xf32> to vector<16xf32>
      %34 = vector.shape_cast %33 : vector<16xf32> to vector<16x1xf32>
      %cst_23 = arith.constant 0.0322580636 : f32
      %35 = vector.broadcast %cst_23 : f32 to vector<16x1xf32>
      %36 = arith.mulf %34, %35 : vector<16x1xf32>
      %37 = math.sqrt %36 : vector<16x1xf32>
      %cst_24 = arith.constant 1.000000e-03 : f32
      %38 = vector.broadcast %cst_24 : f32 to vector<16x1xf32>
      %39 = arith.addf %37, %38 : vector<16x1xf32>
      %40 = vector.broadcast %39 : vector<16x1xf32> to vector<16x32xf32>
      %41 = arith.divf %31, %40 : vector<16x32xf32>
      %c0_25 = arith.constant 0 : index
      %c0_26 = arith.constant 0 : index
      %42 = vector.load %arg7[%c0_25, %c0_26] : memref<1x32xf32, #tpu.memory_space<vmem>>, vector<1x32xf32>
      %43 = vector.broadcast %42 : vector<1x32xf32> to vector<16x32xf32>
      %44 = arith.mulf %41, %43 : vector<16x32xf32>
      %c0_27 = arith.constant 0 : index
      %c0_28 = arith.constant 0 : index
      %45 = vector.load %arg8[%c0_27, %c0_28] : memref<1x32xf32, #tpu.memory_space<vmem>>, vector<1x32xf32>
      %46 = vector.broadcast %45 : vector<1x32xf32> to vector<16x32xf32>
      %47 = arith.addf %44, %46 : vector<16x32xf32>
      %c0_29 = arith.constant 0 : index
      %c0_30 = arith.constant 0 : index
      %48 = vector.load %arg9[%c0_29, %c0_30] : memref<16x32xf32, #tpu.memory_space<vmem>>, vector<16x32xf32>
      tpu.vector_store %arg9[%c0_29, %c0_30], %47 {strides = array<i32>} : memref<16x32xf32, #tpu.memory_space<vmem>>, vector<16x32xf32>,
    } else {
    }
    return
  }
  func.func @transform_0(%arg0: i32, %arg1: i32) -> (i32, i32) {
    %c0_i32 = arith.constant 0 : i32
    %c0_i32_0 = arith.constant 0 : i32
    return %arg0, %c0_i32 : i32, i32
  }
  func.func @transform_1(%arg0: i32, %arg1: i32) -> (i32, i32) {
    %c0_i32 = arith.constant 0 : i32
    %c0_i32_0 = arith.constant 0 : i32
    return %c0_i32, %arg1 : i32, i32
  }
  func.func @transform_2(%arg0: i32, %arg1: i32) -> (i32, i32) {
    %c0_i32 = arith.constant 0 : i32
    %c0_i32_0 = arith.constant 0 : i32
    return %c0_i32, %arg1 : i32, i32
  }
  func.func @transform_3(%arg0: i32, %arg1: i32) -> (i32, i32) {
    %c0_i32 = arith.constant 0 : i32
    %c0_i32_0 = arith.constant 0 : i32
    return %arg1, %c0_i32 : i32, i32
  }
  func.func @transform_4(%arg0: i32, %arg1: i32) -> (i32, i32) {
    %c0_i32 = arith.constant 0 : i32
    %c0_i32_0 = arith.constant 0 : i32
    %c0_i32_1 = arith.constant 0 : i32
    return %c0_i32, %c0_i32_0 : i32, i32
  }
  func.func @transform_5(%arg0: i32, %arg1: i32) -> (i32, i32) {
    %c0_i32 = arith.constant 0 : i32
    %c0_i32_0 = arith.constant 0 : i32
    %c0_i32_1 = arith.constant 0 : i32
    return %c0_i32, %c0_i32_0 : i32, i32
  }
  func.func @transform_6(%arg0: i32, %arg1: i32) -> (i32, i32) {
    %c0_i32 = arith.constant 0 : i32
    %c0_i32_0 = arith.constant 0 : i32
    %c0_i32_1 = arith.constant 0 : i32
    return %c0_i32, %c0_i32_0 : i32, i32
  }
  func.func @transform_7(%arg0: i32, %arg1: i32) -> (i32, i32) {
    %c0_i32 = arith.constant 0 : i32
    %c0_i32_0 = arith.constant 0 : i32
    return %arg0, %c0_i32 : i32, i32
  }
}

</mosaic_0001>

<bundles_post_ra>
// kernel: tpu_custom_call.1
= control target key start
LH: loop header
LB: loop body
LE: loop exit
PB: predicated region body
PF: predicated region fallthrough
CT: control target
= control target key end

     0   :  { %v376_v1 = vmov 0.0   ;;  %vm377_vm0 = vmmov 0   ;;  %vm58_vm1 = vcmask 261120   ;;  %s477_s0 = inlined_call_operand.vmem [shape: bf16[16,32], index: 0, kind: input, shape index: {}]   ;;  %s478_s1 = inlined_call_operand.vmem [shape: bf16[32,64], index: 1, kind: input, shape index: {}]   ;;  %s479_s2 = inlined_call_operand.vmem [shape: f32[1,64], index: 2, kind: input, shape index: {}]   ;;  %s480_s3 = inlined_call_operand.vmem [shape: bf16[64,32], index: 3, kind: input, shape index: {}]   ;;  %s481_s4 = inlined_call_operand.vmem [shape: f32[1,32], index: 4, kind: input, shape index: {}]   ;;  %s482_s5 = inlined_call_operand.vmem [shape: f32[1,32], index: 5, kind: input, shape index: {}]   ;;  %s483_s6 = inlined_call_operand.vmem [shape: f32[1,32], index: 6, kind: input, shape index: {}]   ;;  %s484_s7 = inlined_call_operand.hbm [shape: f32[16,32], index: 7, kind: output, shape index: {}]  }
   0x1   :  { %v336_v0 = vld [vmem:[%s478_s1] sm:$0xff]   ;;  %311 = vmatprep.subr.bf16.mxu0 %v376_v1  ;;  %v337_v2 = vld [vmem:[%s478_s1 + $0x8] sm:$0xff]   ;;  %319 = vmatprep.subr.bf16.mxu1 %v376_v1  ;;  %109 = vst.msk [vmem:[#allocation2] sm:$0xff] %vm58_vm1, %v376_v1  ;;  %110 = vst.msk [vmem:[#allocation2 + $0x8] sm:$0xff] %vm58_vm1, %v376_v1 }
   0x2   :  { %312 = vmatpush3.bf16.msra.mxu0 %v336_v0  ;;  %315 = vmatprep.mubr.msk.bf16.mxu0 %vm377_vm0, %v376_v1  ;;  %v28_v3 = vld [vmem:[%s477_s0] sm:$0xff]   ;;  %v340_v5 = vld [vmem:[%s480_s3 + $0x8] sm:$0xff]  }
   0x3   :  { %313 = vmatprep.subr.bf16.mxu0 %v376_v1  ;;  %v339_v4 = vld [vmem:[%s480_s3] sm:$0xff]   ;;  %327 = vmatprep.mubr.msk.bf16.mxu1 %vm377_vm0, %v376_v1 }
   0x4   :  { %320 = vmatpush3.bf16.msra.mxu1 %v339_v4 }
   0x5   :  { %321 = vmatprep.subr.bf16.mxu1 %v376_v1 }
   0x6   :  { %314 = vmatpush3.bf16.msra.mxu0 %v337_v2 }
   0x7   :  { %12 = vsyncpa [#allocation4], 0  ;;  %v341_v6 = vld [vmem:[%s480_s3 + $0x10] sm:$0xff]   ;;  %v342_v7 = vld [vmem:[%s480_s3 + $0x18] sm:$0xff]   ;;  %vm146_vm2 = vcmask 523264   ;;  %v209_v27 = vunpack.c.l.bf16 %v28_v3  ;;  %v210_v30 = vunpack.c.h.bf16 %v28_v3  ;;  %s378_s18 = smov [#allocation3]  }
   0x8   :  { %322 = vmatpush3.bf16.msra.mxu1 %v340_v5  ;;  %v290_v8 = vld [vmem:[%s479_s2] ss:$0 sm:$0xff]  ;;  %v112_v20 = vld [vmem:[#allocation2 + $0x8] sm:$0xff]  ;;  %s279_s19 = sshll.u32 %s378_s18, 4  ;;  %s280_s19 = int_to_ptr.vmem [resolvable:$true] %s279_s19 }
   0x9   :  { %316 = vmatmul.mubr.msk.bf16.vlgmr.msra.gmra.mrb[0].mxu0 %vm58_vm1, %v28_v3  ;;  %323 = vmatprep.subr.bf16.mxu1 %v376_v1  ;;  %v111_v18 = vld [vmem:[#allocation2] sm:$0xff]  ;;  %s352_s20 = scalar_lea.vmem %s280_s19, 256  ;;  %p357_p1 = scmp.lt.s32.totalorder %s280_s19, %s280_s19 }
   0xa   :  { %v300_v26 = vld [vmem:[%s481_s4] ss:$0 sm:$0xff]  ;;  %p353_p0 = scmp.ne.s32.totalorder %s280_s19, %s352_s20  ;;  %p358_p2 = scmp.lt.s32.totalorder %s352_s20, %s352_s20 }
   0xb   :  { %v301_v0 = vld [vmem:[%s482_s5] ss:$0 sm:$0xff] }
   0xc   :  { %324 = vmatpush3.bf16.msra.mxu1 %v341_v6  ;;  %v302_v2 = vld [vmem:[%s483_s6] ss:$0 sm:$0xff]  ;;  %p359_p3 = por %p358_p2, %p357_p1 }
   0xd   :  { %325 = vmatprep.subr.bf16.mxu1 %v376_v1 }
   0xe   :  { %p360_p4 = pnand %p359_p3, %p353_p0 }
  0x10   :  { %326 = vmatpush3.bf16.msra.mxu1 %v342_v7 }
  0xdc   :  { %v96_v9 = vpop.f32.mrb[0].mxu0 }
  0xdd   :  { %v97_v10 = vadd.f32 %v290_v8, %v96_v9  ;;  %v317_v11 = vpop.f32.mrb[1].mxu0 }
  0xde   :  { %v99_v12 = vpop.f32.mrb[2].mxu0 }
  0xdf   :  { %v100_v13 = vadd.f32 %v290_v8, %v99_v12  ;;  %v318_v14 = vpop.f32.mrb[3].mxu0  ;;  %v103_v15 = vmax.f32 %v97_v10, 0.0 }
  0xe1   :  { %v104_v16 = vmax.f32 %v100_v13, 0.0 }
  0xe3   :  { %v113_v17 = vpack.c.bf16 %v104_v16, %v103_v15 }
  0xe5   :  { %328 = vmatmul.mubr.msk.bf16.vlgmr.msra.gmra.mrb[0].mxu1 %vm146_vm2, %v113_v17 }
 0x1b8   :  { %v184_v19 = vpop.f32.mrb[0].mxu1 }
 0x1b9   :  { %v191_v21 = vadd.f32 %v184_v19, %v111_v18  ;;  %v329_v22 = vpop.f32.mrb[1].mxu1 }
 0x1ba   :  { %v187_v23 = vpop.f32.mrb[2].mxu1 }
 0x1bb   :  { %193 = vst.msk [vmem:[#allocation2] sm:$0xff] %vm58_vm1, %v191_v21  ;;  %v192_v24 = vadd.f32 %v187_v23, %v112_v20  ;;  %v330_v25 = vpop.f32.mrb[3].mxu1 }
 0x1bd   :  { %194 = vst.msk [vmem:[#allocation2 + $0x8] sm:$0xff] %vm58_vm1, %v192_v24 }
 0x1c2   :  { %v198_v28 = vld [vmem:[#allocation2] sm:$0xff] }
 0x1c3   :  { %v207_v29 = vadd.f32 %v300_v26, %v198_v28 }
 0x1c4   :  { %v199_v31 = vld [vmem:[#allocation2 + $0x8] sm:$0xff] }
 0x1c5   :  { %v211_v32 = vadd.f32 %v209_v27, %v207_v29  ;;  %v208_v33 = vadd.f32 %v300_v26, %v199_v31 }
 0x1c7   :  { %v213_v34 = vsel %vm58_vm1, %v211_v32, 0.0  ;;  %v212_v35 = vadd.f32 %v210_v30, %v208_v33 }
 0x1c8   :  { %214 = vadd.xlane.f32.xlu0 %v213_v34 }
 0x1c9   :  { %v216_v36 = vsel %vm58_vm1, %v212_v35, 0.0 }
 0x1cc   :  { %217 = vadd.xlane.f32.xlu0 %v216_v36 }
 0x255   :  { %v215_v37 = vpop.xlane.xlu0 %214 }
 0x256   :  { %v220_v38 = vmul.f32 0.03125, %v215_v37 }
 0x258   :  { %v222_v39 = vsub.f32 %v211_v32, %v220_v38 }
 0x259   :  { %v218_v40 = vpop.xlane.xlu0 %217 }
 0x25a   :  { %v221_v41 = vmul.f32 0.03125, %v218_v40  ;;  %v224_v42 = vmul.f32 %v222_v39, %v222_v39 }
 0x25c   :  { %v223_v43 = vsub.f32 %v212_v35, %v221_v41  ;;  %v226_v44 = vsel %vm58_vm1, %v224_v42, 0.0 }
 0x25d   :  { %227 = vadd.xlane.f32.xlu1 %v226_v44 }
 0x25e   :  { %v225_v45 = vmul.f32 %v223_v43, %v223_v43 }
 0x260   :  { %v229_v46 = vsel %vm58_vm1, %v225_v45, 0.0 }
 0x261   :  { %230 = vadd.xlane.f32.xlu1 %v229_v46 }
 0x2ea   :  { %v228_v47 = vpop.xlane.xlu1 %227 }
 0x2eb   :  { %v232_v48 = vmul.f32 0.032258064, %v228_v47 }
 0x2ed   :  { %344 = vrsqrt.f32 %v232_v48  ;;  %vm236_vm3 = vcmp.eq.f32.partialorder %v232_v48, inf  ;;  %v239_v53 = vand.u32 2147483648, %v232_v48  ;;  %vm238_vm4 = vcmp.eq.f32.partialorder %v232_v48, 0.0 }
 0x2ee   :  { %v231_v49 = vpop.xlane.xlu1 %230 }
 0x2ef   :  { %v233_v50 = vmul.f32 0.032258064, %v231_v49 }
 0x2f1   :  { %346 = vrsqrt.f32 %v233_v50  ;;  %vm243_vm5 = vcmp.eq.f32.partialorder %v233_v50, inf  ;;  %v246_v59 = vand.u32 2147483648, %v233_v50  ;;  %vm245_vm6 = vcmp.eq.f32.partialorder %v233_v50, 0.0 }
 0x2f7   :  { %v345_v51 = vpop.eup %344 }
 0x2f8   :  { %v235_v52 = vmul.f32 %v345_v51, %v232_v48 }
 0x2fa   :  { %v237_v54 = vsel %vm236_vm3, %v232_v48, %v235_v52 }
 0x2fb   :  { %v347_v55 = vpop.eup %346  ;;  %v240_v56 = vsel %vm238_vm4, %v239_v53, %v237_v54 }
 0x2fc   :  { %v248_v57 = vadd.f32 0.001, %v240_v56  ;;  %v242_v58 = vmul.f32 %v347_v55, %v233_v50 }
 0x2fe   :  { %348 = vrcp.f32 %v248_v57  ;;  %v244_v60 = vsel %vm243_vm5, %v233_v50, %v242_v58 }
 0x2ff   :  { %v247_v61 = vsel %vm245_vm6, %v246_v59, %v244_v60 }
 0x300   :  { %v249_v62 = vadd.f32 0.001, %v247_v61 }
 0x302   :  { %350 = vrcp.f32 %v249_v62 }
 0x308   :  { %v349_v63 = vpop.eup %348 }
 0x309   :  { %v251_v1 = vmul.f32 %v349_v63, %v222_v39 }
 0x30b   :  { %v261_v3 = vmul.f32 %v301_v0, %v251_v1 }
 0x30c   :  { %v351_v4 = vpop.eup %350 }
 0x30d   :  { %v253_v5 = vmul.f32 %v351_v4, %v223_v43  ;;  %v270_v6 = vadd.f32 %v302_v2, %v261_v3 }
 0x30f   :  { %v262_v7 = vmul.f32 %v301_v0, %v253_v5  ;;  %272 = vst.msk [vmem:[#allocation3] sm:$0xff] %vm58_vm1, %v270_v6 }
 0x311   :  { %v271_v8 = vadd.f32 %v302_v2, %v262_v7 }
 0x313   :  { %273 = vst.msk [vmem:[#allocation3 + $0x8] sm:$0xff] %vm58_vm1, %v271_v8 }
 0x314   :  { %363 = shalt.err (!%p360_p4)
}
 0x315   :  { %s364_s21 = scalar_lea.hbm %s484_s7, 256 }
 0x316   :  { %p365_p5 = scmp.ne.s32.totalorder %s484_s7, %s364_s21  ;;  %p368_p6 = scmp.lt.u32.totalorder %s364_s21, %s484_s7 }
 0x318   :  { %p370_p7 = pnand %p368_p6, %p365_p5 }
 0x31a   :  { %373 = shalt.err (!%p370_p7)
}
 0x31b   :  { %s379_s26 = smov 128   ;;  %s380_s27 = smov 8  }
 0x31c   :  { %285 = dma.vmem_to_hbm [thread:$0]  %s280_s19, 256, %s484_s7, [#allocation4], %s379_s26, %s379_s26, %s380_s27  }
 0x31d   :  { %374 = dma.done.wait [#allocation4], 256  }
 0x31e   :  { %375 = vsyncadd [#allocation4], 4294967040 }
 0x31f   :  { %289 = vsyncpa [#allocation4], 1 }

</bundles_post_ra>
